<compile_context>
chip_gen: v7x
topology: tpu7x:2x2x1
jax: 0.10.0
libtpu: 0.0.40
codegen_flags: <defaults>
</compile_context>

<pallas_src>
import functools

import jax
import jax.numpy as jnp
import numpy as np
from jax import lax
from jax.experimental import pallas as pl
from jax.experimental.pallas import tpu as pltpu


# ----------------------------------------------------------------------------------
# pltpu.roll direction probe: returns True iff pltpu.roll matches jnp.roll semantics.
# (Makes the tap-shift sign robust either way; resolved eagerly, outside jit.)
# ----------------------------------------------------------------------------------
@functools.lru_cache(maxsize=None)
def _pltpu_roll_matches_numpy():
    def kern(x_ref, o_ref):
        o_ref[...] = pltpu.roll(x_ref[...], 1, 1)

    with jax.ensure_compile_time_eval():
        x = jnp.broadcast_to(jnp.arange(128, dtype=jnp.float32)[None, :], (8, 128))
        y = pl.pallas_call(
            kern, out_shape=jax.ShapeDtypeStruct((8, 128), jnp.float32))(x)
    # numpy convention: roll(x, 1)[0, 1] == x[0, 0] == 0
    return bool(abs(float(jax.device_get(y)[0, 1])) < 0.5)


# ----------------------------------------------------------------------------------
# Kernel 1: fused ConvTranspose3d(k=2, s=2, no bias) + GroupNorm(eps=1e-5) + ReLU.
# One sample per grid step.  x_ref (1, Cin, S); output (1, 8*Cout, S) bf16.
# ----------------------------------------------------------------------------------
def _deconv_gn_relu_kernel(x_ref, w_ref, g_ref, gamma_ref, beta_ref, o_ref, *,
                           inv_count, eps):
    x = x_ref[0]                                                         # (Cin, S)
    y = jnp.dot(w_ref[...], x, preferred_element_type=jnp.float32)       # (8C, S)
    # two-pass GroupNorm statistics (per-sample, per-group over rows x columns)
    rs = jnp.sum(y, axis=1, keepdims=True)                               # (8C, 1)
    mean = jnp.dot(g_ref[...], rs, preferred_element_type=jnp.float32) * inv_count
    cent = y - mean
    rs2 = jnp.sum(cent * cent, axis=1, keepdims=True)
    var = jnp.dot(g_ref[...], rs2, preferred_element_type=jnp.float32) * inv_count
    yn = cent * lax.rsqrt(var + eps) * gamma_ref[...] + beta_ref[...]
    o_ref[0] = jnp.maximum(yn, 0.0).astype(o_ref.dtype)


# ----------------------------------------------------------------------------------
# Kernel 2: Conv3d(k=3, pad=1) + bias + Sigmoid on the parity-decomposed layout.
# One sample per grid step.  64 subpixel combos; each contributes
# (8*OC, C) @ (C, S) -> rolled along lanes -> boundary-masked -> accumulated.
# ----------------------------------------------------------------------------------
def _subpixel_conv_sigmoid_kernel(a_ref, w_ref, b_ref, v_ref, o_ref, *,
                                  combos, c_per_parity):
    a = a_ref[0].astype(jnp.float32)                                     # (8*C, S)
    s_len = a.shape[1]
    kout = b_ref.shape[0]
    vrows = [v_ref[i] for i in range(v_ref.shape[0])]                    # 6 x (1, S)
    acc = jnp.zeros((kout, s_len), jnp.float32)
    for q, (ki, roll_shift, mask_rows) in enumerate(combos):
        slab = a[ki * c_per_parity:(ki + 1) * c_per_parity, :]           # (C, S)
        p = jnp.dot(w_ref[q], slab, preferred_element_type=jnp.float32)  # (8*OC, S)
        if roll_shift:
            p = pltpu.roll(p, roll_shift, 1)
        for r in mask_rows:
            p = p * vrows[r]
        acc = acc + p
    y = acc + b_ref[...]
    o_ref[0] = 1.0 / (1.0 + jnp.exp(-y))


# ----------------------------------------------------------------------------------
# Static plan for the subpixel conv: per dimension, which (input parity, base shift)
# pairs exist and which (output parity, tap) combinations they serve.
# ----------------------------------------------------------------------------------
_COMBOS_1D = (
    # (input_parity, base_shift, ((out_parity, tap_offset i), ...))
    (1, -1, ((0, -1),)),
    (0,  0, ((0,  0), (1, -1))),
    (1,  0, ((0,  1), (1,  0))),
    (0,  1, ((1,  1),)),
)


def _build_subpixel_plan(D, H, W, roll_like_numpy):
    S = D * H * W
    sel = np.zeros((64, 8, 27), np.float32)     # (combo, out_parity, tap) selector
    meta = []
    q = 0
    for (pd, sd, pairs_d) in _COMBOS_1D:
        for (ph, sh, pairs_h) in _COMBOS_1D:
            for (pw, sw, pairs_w) in _COMBOS_1D:
                ki = pd * 4 + ph * 2 + pw
                soff = sd * H * W + sh * W + sw
                shift = ((-soff) % S) if roll_like_numpy else (soff % S)
                rows = []
                if sd == -1:
                    rows.append(0)
                elif sd == 1:
                    rows.append(1)
                if sh == -1:
                    rows.append(2)
                elif sh == 1:
                    rows.append(3)
                if sw == -1:
                    rows.append(4)
                elif sw == 1:
                    rows.append(5)
                for (a, i) in pairs_d:
                    for (b, j) in pairs_h:
                        for (c, l) in pairs_w:
                            ko = a * 4 + b * 2 + c
                            t = (i + 1) * 9 + (j + 1) * 3 + (l + 1)
                            sel[q, ko, t] = 1.0
                meta.append((ki, shift, tuple(rows)))
                q += 1
    # per-dim validity masks on the base grid (precomputed, no in-kernel iota/div)
    s_idx = np.arange(S)
    dd = s_idx // (H * W)
    hh = (s_idx // W) % H
    ww = s_idx % W
    valid = np.stack(
        [(dd >= 1), (dd <= D - 2),
         (hh >= 1), (hh <= H - 2),
         (ww >= 1), (ww <= W - 2)], axis=0).astype(np.float32).reshape(6, 1, S)
    return sel, tuple(meta), valid


# ----------------------------------------------------------------------------------
# Weight standardization exactly as StdConvTranspose3d.forward (incl. torch's
# permute(1,0,2).reshape_as(weight) element reordering).
# ----------------------------------------------------------------------------------
def _standardize_deconv_weight(wd, eps=1e-6):
    cout = wd.shape[1]
    wpm = jnp.transpose(wd, (1, 0, 2, 3, 4)).reshape(1, cout, -1)
    mu = jnp.mean(wpm, axis=(0, 2), keepdims=True)
    var = jnp.mean((wpm - mu) ** 2, axis=(0, 2), keepdims=True)
    wn = (wpm - mu) / jnp.sqrt(var + eps)
    return jnp.transpose(wn, (1, 0, 2)).reshape(wd.shape)


# ----------------------------------------------------------------------------------
# Full forward.  x: (N, Cin, D, H, W) f32 -> (N, num_classes, 2D, 2H, 2W) f32.
# ----------------------------------------------------------------------------------
def seg_head_forward(x, params):
    N, Cin, D, H, W = x.shape
    S = D * H * W
    w_std = _standardize_deconv_weight(params["deconv_w"])     # (Cin, Cout, 2,2,2)
    Cout = int(w_std.shape[1])
    OC = int(params["conv_b"].shape[0])
    K8 = 8 * Cout

    # --- kernel 1 inputs: deconv weights with rows (a*4+b*2+c)*Cout + co, GN helpers ---
    w_mat = jnp.transpose(w_std, (2, 3, 4, 1, 0)).reshape(K8, Cin).astype(jnp.float32)
    num_groups = Cout // 4
    cg = Cout // num_groups
    gid = (np.arange(K8) % Cout) // cg
    gmat = jnp.asarray((gid[:, None] == gid[None, :]).astype(np.float32))   # (K8, K8)
    gamma_row = jnp.tile(params["gn_gamma"].astype(jnp.float32), 8).reshape(K8, 1)
    beta_row = jnp.tile(params["gn_beta"].astype(jnp.float32), 8).reshape(K8, 1)
    inv_count = 1.0 / float(S * 8 * cg)

    x_flat = x.reshape(N, Cin, S).astype(jnp.float32)           # free NCDHW reshape

    act = pl.pallas_call(
        functools.partial(_deconv_gn_relu_kernel, inv_count=inv_count, eps=1e-5),
        out_shape=jax.ShapeDtypeStruct((N, K8, S), jnp.bfloat16),
        grid=(N,),
        in_specs=[
            pl.BlockSpec((1, Cin, S), lambda n: (n, 0, 0)),
            pl.BlockSpec((K8, Cin), lambda n: (0, 0)),
            pl.BlockSpec((K8, K8), lambda n: (0, 0)),
            pl.BlockSpec((K8, 1), lambda n: (0, 0)),
            pl.BlockSpec((K8, 1), lambda n: (0, 0)),
        ],
        out_specs=pl.BlockSpec((1, K8, S), lambda n: (n, 0, 0)),
        compiler_params=pltpu.CompilerParams(dimension_semantics=("parallel",)),
    )(x_flat, w_mat, gmat, gamma_row, beta_row)

    # --- kernel 2 inputs: per-combo stacked conv weights, bias rows, boundary masks ---
    sel, combos, valid = _build_subpixel_plan(D, H, W, _pltpu_roll_matches_numpy())
    wc27 = params["conv_w"].reshape(OC, Cout, 27).astype(jnp.float32)
    w_big = jnp.einsum("qkt,oct->qkoc", jnp.asarray(sel), wc27).reshape(
        64, 8 * OC, Cout)
    bias_row = jnp.tile(params["conv_b"].astype(jnp.float32), 8).reshape(8 * OC, 1)
    KOUT = 8 * OC

    out_stack = pl.pallas_call(
        functools.partial(_subpixel_conv_sigmoid_kernel,
                          combos=combos, c_per_parity=Cout),
        out_shape=jax.ShapeDtypeStruct((N, KOUT, S), jnp.float32),
        grid=(N,),
        in_specs=[
            pl.BlockSpec((1, K8, S), lambda n: (n, 0, 0)),
            pl.BlockSpec((64, KOUT, Cout), lambda n: (0, 0, 0)),
            pl.BlockSpec((KOUT, 1), lambda n: (0, 0)),
            pl.BlockSpec((6, 1, S), lambda n: (0, 0, 0)),
        ],
        out_specs=pl.BlockSpec((1, KOUT, S), lambda n: (n, 0, 0)),
        compiler_params=pltpu.CompilerParams(dimension_semantics=("parallel",)),
    )(act, w_big, bias_row, jnp.asarray(valid))

    # --- tiny glue: parity-decomposed (N, 8*OC, S) -> NCDHW; only OC channels wide ---
    out = out_stack.reshape(N, 2, 2, 2, OC, D, H, W)
    out = jnp.transpose(out, (0, 4, 5, 1, 6, 2, 7, 3))
    return out.reshape(N, OC, 2 * D, 2 * H, 2 * W)


# ----------------------------------------------------------------------------------
# Pure-JAX reference (sanity check).
# ----------------------------------------------------------------------------------
def seg_head_reference(x, params):
    N, Cin, D, H, W = x.shape
    w_std = _standardize_deconv_weight(params["deconv_w"])
    Cout = w_std.shape[1]
    up = jnp.einsum("nidhw,ioabc->nodahbwc", x, w_std,
                    precision=lax.Precision.HIGHEST)
    up = up.reshape(N, Cout, 2 * D, 2 * H, 2 * W)
    G = Cout // 4
    xg = up.reshape(N, G, -1)
    mu = xg.mean(axis=-1, keepdims=True)
    var = ((xg - mu) ** 2).mean(axis=-1, keepdims=True)
    xn = ((xg - mu) / jnp.sqrt(var + 1e-5)).reshape(up.shape)
    gamma = params["gn_gamma"].reshape(1, Cout, 1, 1, 1)
    beta = params["gn_beta"].reshape(1, Cout, 1, 1, 1)
    a = jnp.maximum(xn * gamma + beta, 0.0)
    y = lax.conv_general_dilated(
        a, params["conv_w"], (1, 1, 1), [(1, 1)] * 3,
        dimension_numbers=("NCDHW", "OIDHW", "NCDHW"),
        precision=lax.Precision.HIGHEST)
    y = y + params["conv_b"].reshape(1, -1, 1, 1, 1)
    return 1.0 / (1.0 + jnp.exp(-y))


if __name__ == "__main__":
    N, Cin, D, H, W = 2, 4, 8, 8, 8
    FS, NC = 16, 1                      # feature_size, num_classes

    key = jax.random.PRNGKey(0)
    k1, k2, k3, k4, k5, k6 = jax.random.split(key, 6)
    params = {
        "deconv_w": jax.random.normal(k1, (Cin, FS, 2, 2, 2), jnp.float32) * 0.2,
        "gn_gamma": 1.0 + 0.1 * jax.random.normal(k2, (FS,), jnp.float32),
        "gn_beta": 0.1 * jax.random.normal(k3, (FS,), jnp.float32),
        "conv_w": jax.random.normal(k4, (NC, FS, 3, 3, 3), jnp.float32) * 0.1,
        "conv_b": 0.1 * jax.random.normal(k5, (NC,), jnp.float32),
    }
    x = jax.random.normal(k6, (N, Cin, D, H, W), jnp.float32)

    # Resolve the pltpu.roll convention eagerly (outside jit).
    _pltpu_roll_matches_numpy()

    out = jax.block_until_ready(jax.jit(seg_head_forward)(x, params))
    assert out.shape == (N, NC, 2 * D, 2 * H, 2 * W), out.shape

    ref = jax.block_until_ready(jax.jit(seg_head_reference)(x, params))
    max_diff = float(jnp.max(jnp.abs(out - ref)))
    assert max_diff < 5e-2, f"max abs diff too large: {max_diff}"

    print("KERNEL_OK")
</pallas_src>

<mosaic_0001>
module attributes {stable_mosaic.version = 11 : i64} {
  func.func @kern(%arg0: memref<8x128xf32, #tpu.memory_space<vmem>>, %arg1: memref<8x128xf32, #tpu.memory_space<vmem>>) attributes {dimension_semantics = [], scalar_prefetch = 0 : i64, scratch_operands = 0 : i64, tpu.core_type = #tpu.core_type<tc>} {
    %c0 = arith.constant 0 : index
    %c0_0 = arith.constant 0 : index
    %0 = vector.load %arg0[%c0, %c0_0] : memref<8x128xf32, #tpu.memory_space<vmem>>, vector<8x128xf32>
    %c1_i32 = arith.constant 1 : i32
    %1 = tpu.dynamic_rotate %0 by %c1_i32 dim 1 : vector<8x128xf32>, i32 -> vector<8x128xf32>
    %c0_1 = arith.constant 0 : index
    %c0_2 = arith.constant 0 : index
    %2 = vector.load %arg1[%c0_1, %c0_2] : memref<8x128xf32, #tpu.memory_space<vmem>>, vector<8x128xf32>
    tpu.vector_store %arg1[%c0_1, %c0_2], %1 {strides = array<i32>} : memref<8x128xf32, #tpu.memory_space<vmem>>, vector<8x128xf32>,
    return
  }
}

</mosaic_0001>

<bundles_post_ra>
// kernel: tpu_custom_call.1
= control target key start
LH: loop header
LB: loop body
LE: loop exit
PB: predicated region body
PF: predicated region fallthrough
CT: control target
= control target key end

     0   :  { %6 = vsyncpa [#allocation3], 0  ;;  %s128_s0 = inlined_call_operand.hbm [shape: f32[8,128], index: 0, kind: input, shape index: {}]   ;;  %s129_s1 = inlined_call_operand.hbm [shape: f32[8,128], index: 1, kind: output, shape index: {}]  }
   0x1   :  { %7 = vsyncpa [#allocation4], 0  ;;  %s91_s6 = smov [#allocation2]   ;;  %s43_s10 = scalar_lea.hbm %s128_s0, 128 }
   0x2   :  { %s14_s7 = sshll.u32 %s91_s6, 4  ;;  %p44_p0 = scmp.ne.s32.totalorder %s128_s0, %s43_s10  ;;  %s15_s7 = int_to_ptr.vmem [resolvable:$true] %s14_s7 }
   0x3   :  { %p47_p1 = scmp.lt.u32.totalorder %s43_s10, %s128_s0 }
   0x5   :  { %p49_p2 = pnand %p47_p1, %p44_p0 }
   0x7   :  { %52 = shalt.err (!%p49_p2)
}
   0x8   :  { %s53_s15 = scalar_lea.vmem %s15_s7, 128  ;;  %p58_p4 = scmp.lt.s32.totalorder %s15_s7, %s15_s7 }
   0x9   :  { %p54_p3 = scmp.ne.s32.totalorder %s15_s7, %s53_s15  ;;  %p59_p5 = scmp.lt.s32.totalorder %s53_s15, %s53_s15 }
   0xb   :  { %p60_p6 = por %p59_p5, %p58_p4 }
   0xd   :  { %p61_p7 = pnand %p60_p6, %p54_p3 }
   0xf   :  { %64 = shalt.err (!%p61_p7)
}
  0x10   :  { %17 = dma.hbm_to_vmem [thread:$0]  %s128_s0, 128, %s15_s7, [#allocation3]  }
  0x11   :  { %87 = dma.done.wait [#allocation3], 128  }
  0x12   :  { %88 = vsyncadd [#allocation3], 4294967168  ;;  %v21_v0 = vld [vmem:[#allocation2] sm:$0xff]  ;;  %s92_s18 = smov 1   ;;  %s93_s19 = smov [#allocation5]  }
  0x13   :  { %22 = vrot.lane.b32.xlu0 %v21_v0, %s92_s18  ;;  %s31_s20 = sshll.u32 %s93_s19, 4  ;;  %s32_s20 = int_to_ptr.vmem [resolvable:$true] %s31_s20 }
  0x14   :  { %s65_s21 = scalar_lea.vmem %s32_s20, 128  ;;  %p70_p9 = scmp.lt.s32.totalorder %s32_s20, %s32_s20 }
  0x15   :  { %p66_p8 = scmp.ne.s32.totalorder %s32_s20, %s65_s21  ;;  %p71_p10 = scmp.lt.s32.totalorder %s65_s21, %s65_s21 }
  0x17   :  { %p72_p11 = por %p71_p10, %p70_p9 }
  0x19   :  { %p73_p12 = pnand %p72_p11, %p66_p8 }
  0x85   :  { %v23_v1 = vpop.permute.xlu0 %22 }
  0x86   :  { %24 = vst [vmem:[#allocation5] sm:$0xff] %v23_v1 }
  0x87   :  { %76 = shalt.err (!%p73_p12)
}
  0x88   :  { %s77_s0 = scalar_lea.hbm %s129_s1, 128 }
  0x89   :  { %p78_p13 = scmp.ne.s32.totalorder %s129_s1, %s77_s0  ;;  %p81_p0 = scmp.lt.u32.totalorder %s77_s0, %s129_s1 }
  0x8b   :  { %p83_p1 = pnand %p81_p0, %p78_p13 }
  0x8d   :  { %86 = shalt.err (!%p83_p1)
}
  0x8e   :  { %34 = dma.vmem_to_hbm [thread:$0]  %s32_s20, 128, %s129_s1, [#allocation4]  }
  0x8f   :  { %89 = dma.done.wait [#allocation4], 128  }
  0x90   :  { %90 = vsyncadd [#allocation4], 4294967168 }
  0x91   :  { %38 = vsyncpa [#allocation3], 1 }
  0x92   :  { %39 = vsyncpa [#allocation4], 1 }

</bundles_post_ra>
